<compile_context>
chip_gen: v7x
topology: tpu7x:2x2x1
jax: 0.10.0
libtpu: 0.0.40
codegen_flags: <defaults>
</compile_context>

<pallas_src>
import functools

import jax
import jax.numpy as jnp
from jax.experimental import pallas as pl
from jax.experimental.pallas import tpu as pltpu

_BLOCK_BYTES_BUDGET = 2 * 1024 * 1024  # per input, per pipeline buffer


def _largest_divisor_under(n: int, limit: int) -> int:
    limit = max(1, min(n, limit))
    for d in range(limit, 0, -1):
        if n % d == 0:
            return d
    return 1


def _detect_num_cores() -> int:
    """2 TensorCores visible to one kernel only on v7x-class chips."""
    try:
        kind = jax.devices()[0].device_kind.lower()
    except Exception:  # pragma: no cover - defensive
        return 1
    return 2 if "7" in kind else 1


def _mse_kernel(pred_ref, tgt_ref, out_ref, *, blocks_per_core, total_blocks,
                needs_guard):
    # pred_ref: (tB, C, L)   tgt_ref: (tB, L, C)   out_ref: (1, C, L) f32 acc
    @pl.when(pl.program_id(1) == 0)
    def _init():
        out_ref[...] = jnp.zeros_like(out_ref)

    def _accumulate():
        p = pred_ref[...].astype(jnp.float32)                       # (tB, C, L)
        t = jnp.swapaxes(tgt_ref[...].astype(jnp.float32), 1, 2)    # (tB, C, L)
        diff = p - t
        # Sum over the batch-tile axis only: pure VPU adds, no cross-lane
        # reduce in the hot loop.
        out_ref[...] += jnp.sum(diff * diff, axis=0, keepdims=True)

    if needs_guard:
        blk = pl.program_id(0) * blocks_per_core + pl.program_id(1)
        pl.when(blk < total_blocks)(_accumulate)
    else:
        _accumulate()


def mse_loss(pred: jax.Array, target: jax.Array, *, num_cores=None) -> jax.Array:
    """mean((pred.permute(0,2,1) - target)**2), pred (B,C,L), target (B,L,C)."""
    B, C, L = pred.shape
    assert target.shape == (B, L, C), f"target shape {target.shape} != {(B, L, C)}"
    n_elems = B * C * L

    if num_cores is None:
        num_cores = _detect_num_cores()

    elem_bytes = max(jnp.dtype(pred.dtype).itemsize,
                     jnp.dtype(target.dtype).itemsize)
    per_sample = C * L * elem_bytes
    max_tb = max(1, _BLOCK_BYTES_BUDGET // max(per_sample, 1))
    tB = _largest_divisor_under(B, max_tb)

    total_blocks = B // tB
    num_cores = min(num_cores, total_blocks)  # never more cores than blocks
    blocks_per_core = (total_blocks + num_cores - 1) // num_cores
    needs_guard = num_cores * blocks_per_core > total_blocks

    def in_map(c, i):
        blk = c * blocks_per_core + i
        if needs_guard:
            # Clamp the DMA to a valid block; the kernel skips the accumulate.
            blk = jnp.minimum(blk, total_blocks - 1)
        return (blk, 0, 0)

    kernel = functools.partial(
        _mse_kernel,
        blocks_per_core=blocks_per_core,
        total_blocks=total_blocks,
        needs_guard=needs_guard,
    )

    core_sem = pltpu.CORE_PARALLEL if num_cores > 1 else pltpu.ARBITRARY

    partial = pl.pallas_call(
        kernel,
        out_shape=jax.ShapeDtypeStruct((num_cores, C, L), jnp.float32),
        grid_spec=pltpu.PrefetchScalarGridSpec(
            num_scalar_prefetch=0,
            grid=(num_cores, blocks_per_core),
            in_specs=[
                pl.BlockSpec((tB, C, L), in_map),   # pred, native layout
                pl.BlockSpec((tB, L, C), in_map),   # target, native layout
            ],
            out_specs=pl.BlockSpec((1, C, L), lambda c, i: (c, 0, 0)),
        ),
        compiler_params=pltpu.CompilerParams(
            dimension_semantics=(core_sem, pltpu.ARBITRARY),
        ),
    )(pred, target)

    # Single tiny final reduce + mean, once, outside the hot loop.
    return (jnp.sum(partial) / jnp.float32(n_elems)).astype(jnp.float32)


if __name__ == "__main__":
    key = jax.random.PRNGKey(0)
    k1, k2 = jax.random.split(key)

    B, C, L = 2, 4, 16
    pred = jax.random.normal(k1, (B, C, L), dtype=jnp.float32)
    target = jax.random.normal(k2, (B, L, C), dtype=jnp.float32)

    loss = mse_loss(pred, target)
    jax.block_until_ready(loss)

    # reference check (plain JAX)
    ref = jnp.mean((jnp.swapaxes(pred, 1, 2) - target) ** 2)
    assert jnp.allclose(loss, ref, atol=1e-6, rtol=1e-6), (loss, ref)

    print("KERNEL_OK")
</pallas_src>

<mosaic_0001>
module attributes {stable_mosaic.version = 11 : i64} {
  func.func @_mse_kernel(%arg0: i32, %arg1: i32, %arg2: memref<2x4x16xf32, #tpu.memory_space<vmem>>, %arg3: memref<2x16x4xf32, #tpu.memory_space<vmem>>, %arg4: memref<1x4x16xf32, #tpu.memory_space<vmem>>) attributes {dimension_semantics = [#tpu.dimension_semantics<arbitrary>, #tpu.dimension_semantics<arbitrary>], iteration_bounds = array<i64: 1, 1>, scalar_prefetch = 0 : i64, scratch_operands = 0 : i64, tpu.core_type = #tpu.core_type<tc>, window_params = [{transform_indices = @transform_0, window_bounds = array<i64: 2, 4, 16>}, {transform_indices = @transform_1, window_bounds = array<i64: 2, 16, 4>}, {transform_indices = @transform_2, window_bounds = array<i64: 1, 4, 16>}]} {
    %c0_i32 = arith.constant 0 : i32
    %0 = arith.cmpi eq, %arg1, %c0_i32 : i32
    %1 = arith.extui %0 : i1 to i32
    %c0_i32_0 = arith.constant 0 : i32
    %2 = arith.cmpi ne, %1, %c0_i32_0 : i32
    scf.if %2 {
      %cst_12 = arith.constant 0.000000e+00 : f32
      %13 = vector.broadcast %cst_12 : f32 to vector<1x4x16xf32>
      %c0_13 = arith.constant 0 : index
      %c0_14 = arith.constant 0 : index
      %c0_15 = arith.constant 0 : index
      %14 = vector.load %arg4[%c0_13, %c0_14, %c0_15] : memref<1x4x16xf32, #tpu.memory_space<vmem>>, vector<1x4x16xf32>
      tpu.vector_store %arg4[%c0_13, %c0_14, %c0_15], %13 {strides = array<i32>} : memref<1x4x16xf32, #tpu.memory_space<vmem>>, vector<1x4x16xf32>,
    } else {
    }
    %c0 = arith.constant 0 : index
    %c0_1 = arith.constant 0 : index
    %c0_2 = arith.constant 0 : index
    %3 = vector.load %arg2[%c0, %c0_1, %c0_2] : memref<2x4x16xf32, #tpu.memory_space<vmem>>, vector<2x4x16xf32>
    %c0_3 = arith.constant 0 : index
    %c0_4 = arith.constant 0 : index
    %c0_5 = arith.constant 0 : index
    %4 = vector.load %arg3[%c0_3, %c0_4, %c0_5] : memref<2x16x4xf32, #tpu.memory_space<vmem>>, vector<2x16x4xf32>
    %5 = tpu.transpose %4, [0, 2, 1] : vector<2x16x4xf32> -> vector<2x4x16xf32>
    %6 = arith.subf %3, %5 : vector<2x4x16xf32>
    %c0_6 = arith.constant 0 : index
    %c0_7 = arith.constant 0 : index
    %c0_8 = arith.constant 0 : index
    %7 = vector.load %arg4[%c0_6, %c0_7, %c0_8] : memref<1x4x16xf32, #tpu.memory_space<vmem>>, vector<1x4x16xf32>
    %8 = arith.mulf %6, %6 : vector<2x4x16xf32>
    %cst = arith.constant dense<0.000000e+00> : vector<4x16xf32>
    %9 = vector.multi_reduction <add>, %8, %cst [0] : vector<2x4x16xf32> to vector<4x16xf32>
    %10 = vector.shape_cast %9 : vector<4x16xf32> to vector<1x4x16xf32>
    %11 = arith.addf %7, %10 : vector<1x4x16xf32>
    %c0_9 = arith.constant 0 : index
    %c0_10 = arith.constant 0 : index
    %c0_11 = arith.constant 0 : index
    %12 = vector.load %arg4[%c0_9, %c0_10, %c0_11] : memref<1x4x16xf32, #tpu.memory_space<vmem>>, vector<1x4x16xf32>
    tpu.vector_store %arg4[%c0_9, %c0_10, %c0_11], %11 {strides = array<i32>} : memref<1x4x16xf32, #tpu.memory_space<vmem>>, vector<1x4x16xf32>,
    return
  }
  func.func @transform_0(%arg0: i32, %arg1: i32) -> (i32, i32, i32) {
    %c1_i32 = arith.constant 1 : i32
    %0 = arith.muli %arg0, %c1_i32 : i32
    %1 = arith.addi %0, %arg1 : i32
    %c0_i32 = arith.constant 0 : i32
    %c0_i32_0 = arith.constant 0 : i32
    %c0_i32_1 = arith.constant 0 : i32
    return %1, %c0_i32, %c0_i32_0 : i32, i32, i32
  }
  func.func @transform_1(%arg0: i32, %arg1: i32) -> (i32, i32, i32) {
    %c1_i32 = arith.constant 1 : i32
    %0 = arith.muli %arg0, %c1_i32 : i32
    %1 = arith.addi %0, %arg1 : i32
    %c0_i32 = arith.constant 0 : i32
    %c0_i32_0 = arith.constant 0 : i32
    %c0_i32_1 = arith.constant 0 : i32
    return %1, %c0_i32, %c0_i32_0 : i32, i32, i32
  }
  func.func @transform_2(%arg0: i32, %arg1: i32) -> (i32, i32, i32) {
    %c0_i32 = arith.constant 0 : i32
    %c0_i32_0 = arith.constant 0 : i32
    %c0_i32_1 = arith.constant 0 : i32
    return %arg0, %c0_i32, %c0_i32_0 : i32, i32, i32
  }
}

</mosaic_0001>

<bundles_post_ra>
// kernel: tpu_custom_call.1
= control target key start
LH: loop header
LB: loop body
LE: loop exit
PB: predicated region body
PF: predicated region fallthrough
CT: control target
= control target key end

     0   :  { %vm63_vm0 = vcmask 125952   ;;  %v198_v2 = vmov 0.0   ;;  %s249_s0 = inlined_call_operand.vmem [shape: f32[2,4,16], index: 0, kind: input, shape index: {}]   ;;  %s250_s1 = inlined_call_operand.vmem [shape: f32[2,16,4], index: 1, kind: input, shape index: {}]   ;;  %s251_s2 = inlined_call_operand.hbm [shape: f32[1,4,16], index: 2, kind: output, shape index: {}]  }
   0x1   :  { %v69_v0 = vld [vmem:[%s250_s1 + $0x10] sm:$0xff]  ;;  %v67_v1 = vld [vmem:[%s250_s1] sm:$0xff]  ;;  %64 = vst.msk [vmem:[#allocation2] sm:$0xf] %vm63_vm0, %v198_v2  ;;  %v70_v3 = vld [vmem:[%s250_s1 + $0x18] sm:$0xff] }
   0x2   :  { %103 = vxpose.xlu1.b32.start [1/2] (short) (narrow) %v69_v0, 8  ;;  %71 = vxpose.xlu0.b32.start [1/2] (short) (narrow) %v67_v1, 8  ;;  %v68_v4 = vld [vmem:[%s250_s1 + $0x8] sm:$0xff] }
   0x3   :  { %7 = vsyncpa [#allocation3], 0  ;;  %v66_v5 = vld [vmem:[%s249_s0 + $0x4] sm:$0xf]  ;;  %v65_v6 = vld [vmem:[%s249_s0] sm:$0xf] }
   0x4   :  { %s199_s1 = smov [#allocation2]  }
   0x5   :  { %s152_s21 = sshll.u32 %s199_s1, 4  ;;  %s153_s21 = int_to_ptr.vmem [resolvable:$true] %s152_s21 }
   0x6   :  { %104 = vxpose.xlu1.b32.end [2/2] (short) (narrow) %v70_v3, 8  ;;  %72 = vxpose.xlu0.b32.end [2/2] (short) (narrow) %v68_v4, 8  ;;  %s174_s22 = scalar_lea.vmem %s153_s21, 64  ;;  %p179_p1 = scmp.lt.s32.totalorder %s153_s21, %s153_s21 }
   0x7   :  { %p175_p0 = scmp.ne.s32.totalorder %s153_s21, %s174_s22  ;;  %p180_p2 = scmp.lt.s32.totalorder %s174_s22, %s174_s22 }
   0x8   :  { %v137_v15 = vld [vmem:[#allocation2] sm:$0xf] }
   0x9   :  { %p181_p3 = por %p180_p2, %p179_p1 }
   0xb   :  { %p182_p4 = pnand %p181_p3, %p175_p0 }
  0x82   :  { %v119_v7 = vpop.trf.xlu1  ;;  %v87_v8 = vpop.trf.xlu0 }
  0x83   :  { %v136_v9 = vsub.f32 %v66_v5, %v119_v7  ;;  %v135_v10 = vsub.f32 %v65_v6, %v87_v8 }
  0x85   :  { %v139_v11 = vmul.f32 %v136_v9, %v136_v9  ;;  %v138_v12 = vmul.f32 %v135_v10, %v135_v10 }
  0x87   :  { %v142_v13 = vsel %vm63_vm0, %v139_v11, 0.0  ;;  %v141_v14 = vsel %vm63_vm0, %v138_v12, 0.0 }
  0x88   :  { %v143_v16 = vadd.f32 %v142_v13, %v141_v14 }
  0x8a   :  { %v144_v17 = vadd.f32 %v143_v16, %v137_v15 }
  0x8c   :  { %145 = vst.msk [vmem:[#allocation2] sm:$0xf] %vm63_vm0, %v144_v17 }
  0x8d   :  { %185 = shalt.err (!%p182_p4)
}
  0x8e   :  { %s186_s24 = scalar_lea.hbm %s251_s2, 64 }
  0x8f   :  { %p187_p5 = scmp.ne.s32.totalorder %s251_s2, %s186_s24  ;;  %p190_p6 = scmp.lt.u32.totalorder %s186_s24, %s251_s2 }
  0x91   :  { %p192_p7 = pnand %p190_p6, %p187_p5 }
  0x93   :  { %195 = shalt.err (!%p192_p7)
}
  0x94   :  { %155 = dma.vmem_to_hbm [thread:$0]  %s153_s21, 64, %s251_s2, [#allocation3]  }
  0x95   :  { %196 = dma.done.wait [#allocation3], 64  }
  0x96   :  { %197 = vsyncadd [#allocation3], 4294967232 }
  0x97   :  { %159 = vsyncpa [#allocation3], 1 }

</bundles_post_ra>
